<compile_context>
chip_gen: v6e
topology: v6e:2x2x1
jax: 0.10.0
libtpu: 0.0.40
codegen_flags: <defaults>
</compile_context>

<pallas_src>
import jax
import jax.numpy as jnp
from jax import lax
from jax.experimental import pallas as pl
from jax.experimental.pallas import tpu as pltpu


def _round_up(x, m):
    return (x + m - 1) // m * m


def _vision_embed_kernel(tokens_ref, w_ref, pos_ref, o_ref):
    # tokens_ref: (1, TS, Kp)  bf16  -- zero cls row + flattened patches (+ pad)
    # w_ref:      (Kp, Dp)     bf16  -- padded projection matrix
    # pos_ref:    (TS, Dp)     f32   -- row 0: cls+pos[0]; rows 1..N: pos+bias
    # o_ref:      (1, TS, Dp)  f32
    proj = jnp.dot(tokens_ref[0], w_ref[...],
                   preferred_element_type=jnp.float32)        # MXU, f32 accum
    o_ref[0] = proj + pos_ref[...]


def vision_embedding(x, conv_w, conv_b, cls_tok, pos_emb, *, patch_size,
                     seq_tile=256):
    """x: (B, C, H, W) float32. Returns (B, N+1, D) float32 (module semantics)."""
    B, C, H, W = x.shape
    D = conv_w.shape[0]
    P = patch_size
    assert H % P == 0 and W % P == 0, "image size must be divisible by patch size"
    nh, nw = H // P, W // P
    N = nh * nw
    S = N + 1                     # +1 cls position
    K = C * P * P
    Kp = _round_up(K, 128)        # lane-align contraction dim
    Dp = _round_up(D, 128)        # lane-align output dim

    # Sequence tiling: either the full (8-aligned) sequence in one tile, or
    # seq_tile-sized tiles with the sequence padded to a multiple of the tile
    # so every block is full (no masked edge stores).
    assert seq_tile % 8 == 0
    if S <= seq_tile:
        TS = _round_up(S, 8)
        Sp = TS
    else:
        TS = seq_tile
        Sp = _round_up(S, TS)

    # ---- host-side layout glue (bf16 to halve the HBM round trip) ----------
    # TODO(synk): fuse this transpose/pad into the pallas operand DMA
    # (allow_input_fusion) or gather patches in-kernel via strided DMA so the
    # patch matrix is never materialized in HBM.
    xb = x.astype(jnp.bfloat16)
    patches = xb.reshape(B, C, nh, P, nw, P)
    patches = patches.transpose(0, 2, 4, 1, 3, 5).reshape(B, N, K)
    # Prepend one all-zero row per image (the cls position), pad the sequence
    # tail to Sp and the contraction dim K -> Kp.
    tokens = jnp.pad(patches, ((0, 0), (1, Sp - S), (0, Kp - K)))      # (B,Sp,Kp)

    # Projection matrix (Kp, Dp) in bf16.  For static weights this
    # pad/transpose/cast should be hoisted out of the step function.
    w_mat = jnp.pad(conv_w.reshape(D, K), ((0, Dp - D), (0, Kp - K)))
    w_mat = w_mat.T.astype(jnp.bfloat16)                               # (Kp,Dp)

    # Fold conv bias and cls token into one position table (kept f32):
    #   row 0     = cls + pos[0]        (zero token row contributes nothing)
    #   row 1 + n = pos[1 + n] + bias
    pos_tab = jnp.concatenate(
        [(cls_tok + pos_emb[0])[None, :], pos_emb[1:] + conv_b[None, :]], axis=0)
    pos_tab = jnp.pad(pos_tab.astype(jnp.float32),
                      ((0, Sp - S), (0, Dp - D)))                      # (Sp,Dp)

    # ---- pallas call --------------------------------------------------------
    grid = (B, Sp // TS)

    out = pl.pallas_call(
        _vision_embed_kernel,
        out_shape=jax.ShapeDtypeStruct((B, Sp, Dp), jnp.float32),
        grid_spec=pltpu.PrefetchScalarGridSpec(
            num_scalar_prefetch=0,
            grid=grid,
            in_specs=[
                pl.BlockSpec((1, TS, Kp), lambda b, s: (b, s, 0)),   # tokens
                pl.BlockSpec((Kp, Dp), lambda b, s: (0, 0)),         # weights
                pl.BlockSpec((TS, Dp), lambda b, s: (s, 0)),         # pos table
            ],
            out_specs=pl.BlockSpec((1, TS, Dp), lambda b, s: (b, s, 0)),
        ),
        compiler_params=pltpu.CompilerParams(
            # Both axes independent -> v7x shards grid steps across its 2 TCs.
            dimension_semantics=("parallel", "parallel"),
        ),
    )(tokens, w_mat, pos_tab)

    if Sp != S or Dp != D:
        out = out[:, :S, :D]
    return out


def _reference(x, conv_w, conv_b, cls_tok, pos_emb, *, patch_size):
    """Pure-JAX reference (strided conv) with matching bf16 matmul inputs."""
    B = x.shape[0]
    D = conv_w.shape[0]
    y = lax.conv_general_dilated(
        x.astype(jnp.bfloat16), conv_w.astype(jnp.bfloat16),
        window_strides=(patch_size, patch_size),
        padding="VALID",
        dimension_numbers=("NCHW", "OIHW", "NCHW"),
        preferred_element_type=jnp.float32,
    ) + conv_b.reshape(1, D, 1, 1)                          # (B, D, nh, nw)
    patch_embeds = y.reshape(B, D, -1).transpose(0, 2, 1)   # (B, N, D)
    class_embeds = jnp.broadcast_to(cls_tok.reshape(1, 1, D), (B, 1, D))
    seq = jnp.concatenate([class_embeds, patch_embeds], axis=1)
    return seq + pos_emb[None]


if __name__ == "__main__":
    # Small module-consistent shapes: embed_dim=32, image=16, patch=4, C=4, B=2
    # -> 16 patches + 1 cls = 17 positions.
    B, C, H, W = 2, 4, 16, 16
    D, P = 32, 4
    N = (H // P) * (W // P)

    key = jax.random.PRNGKey(0)
    kx, kw, kb, kc, kp = jax.random.split(key, 5)
    x = jax.random.normal(kx, (B, C, H, W), dtype=jnp.float32)
    conv_w = jax.random.normal(kw, (D, C, P, P), dtype=jnp.float32) * 0.02
    conv_b = jax.random.normal(kb, (D,), dtype=jnp.float32) * 0.02
    cls_tok = jax.random.normal(kc, (D,), dtype=jnp.float32)
    pos_emb = jax.random.normal(kp, (N + 1, D), dtype=jnp.float32) * 0.02

    out = vision_embedding(x, conv_w, conv_b, cls_tok, pos_emb, patch_size=P)
    out = jax.block_until_ready(out)

    ref = _reference(x, conv_w, conv_b, cls_tok, pos_emb, patch_size=P)
    assert out.shape == (B, N + 1, D)
    assert jnp.allclose(out, ref, atol=2e-3, rtol=2e-3), float(
        jnp.max(jnp.abs(out - ref)))

    print("KERNEL_OK")
</pallas_src>

<mosaic_0001>
module attributes {stable_mosaic.version = 11 : i64} {
  func.func @_vision_embed_kernel(%arg0: i32, %arg1: i32, %arg2: memref<1x24x128xbf16, #tpu.memory_space<vmem>>, %arg3: memref<128x128xbf16, #tpu.memory_space<vmem>>, %arg4: memref<24x128xf32, #tpu.memory_space<vmem>>, %arg5: memref<1x24x128xf32, #tpu.memory_space<vmem>>) attributes {dimension_semantics = [#tpu.dimension_semantics<parallel>, #tpu.dimension_semantics<parallel>], iteration_bounds = array<i64: 2, 1>, scalar_prefetch = 0 : i64, scratch_operands = 0 : i64, tpu.core_type = #tpu.core_type<tc>, window_params = [{transform_indices = @transform_0, window_bounds = array<i64: 1, 24, 128>}, {pipeline_mode = #tpu.pipeline_mode<synchronous>, transform_indices = @transform_1, window_bounds = array<i64: 128, 128>}, {transform_indices = @transform_2, window_bounds = array<i64: 24, 128>}, {transform_indices = @transform_3, window_bounds = array<i64: 1, 24, 128>}]} {
    %c0 = arith.constant 0 : index
    %c0_0 = arith.constant 0 : index
    %c0_1 = arith.constant 0 : index
    %0 = vector.load %arg2[%c0, %c0_0, %c0_1] : memref<1x24x128xbf16, #tpu.memory_space<vmem>>, vector<1x24x128xbf16>
    %1 = vector.shape_cast %0 : vector<1x24x128xbf16> to vector<24x128xbf16>
    %c0_2 = arith.constant 0 : index
    %c0_3 = arith.constant 0 : index
    %2 = vector.load %arg3[%c0_2, %c0_3] : memref<128x128xbf16, #tpu.memory_space<vmem>>, vector<128x128xbf16>
    %cst = arith.constant dense<0.000000e+00> : vector<24x128xf32>
    %3 = tpu.matmul %1, %2, %cst {dimension_numbers = #tpu.dot_dimension_numbers<[1], [0], [0], [1], [0, 0, 1, 1], [], []>} : vector<24x128xbf16>, vector<128x128xbf16>, vector<24x128xf32> -> vector<24x128xf32>
    %c0_4 = arith.constant 0 : index
    %c0_5 = arith.constant 0 : index
    %4 = vector.load %arg4[%c0_4, %c0_5] : memref<24x128xf32, #tpu.memory_space<vmem>>, vector<24x128xf32>
    %5 = arith.addf %3, %4 : vector<24x128xf32>
    %c0_6 = arith.constant 0 : index
    %c0_7 = arith.constant 0 : index
    %c0_8 = arith.constant 0 : index
    %6 = vector.load %arg5[%c0_6, %c0_7, %c0_8] : memref<1x24x128xf32, #tpu.memory_space<vmem>>, vector<1x24x128xf32>
    %7 = vector.shape_cast %6 : vector<1x24x128xf32> to vector<24x128xf32>
    %8 = vector.shape_cast %5 : vector<24x128xf32> to vector<1x24x128xf32>
    tpu.vector_store %arg5[%c0_6, %c0_7, %c0_8], %8 {strides = array<i32>} : memref<1x24x128xf32, #tpu.memory_space<vmem>>, vector<1x24x128xf32>,
    return
  }
  func.func @transform_0(%arg0: i32, %arg1: i32) -> (i32, i32, i32) {
    %c0_i32 = arith.constant 0 : i32
    %c0_i32_0 = arith.constant 0 : i32
    return %arg0, %arg1, %c0_i32 : i32, i32, i32
  }
  func.func @transform_1(%arg0: i32, %arg1: i32) -> (i32, i32) {
    %c0_i32 = arith.constant 0 : i32
    %c0_i32_0 = arith.constant 0 : i32
    %c0_i32_1 = arith.constant 0 : i32
    return %c0_i32, %c0_i32_0 : i32, i32
  }
  func.func @transform_2(%arg0: i32, %arg1: i32) -> (i32, i32) {
    %c0_i32 = arith.constant 0 : i32
    %c0_i32_0 = arith.constant 0 : i32
    return %arg1, %c0_i32 : i32, i32
  }
  func.func @transform_3(%arg0: i32, %arg1: i32) -> (i32, i32, i32) {
    %c0_i32 = arith.constant 0 : i32
    %c0_i32_0 = arith.constant 0 : i32
    return %arg0, %arg1, %c0_i32 : i32, i32, i32
  }
}

</mosaic_0001>

<bundles_post_ra>
// kernel: tpu_custom_call.1
= control target key start
LH: loop header
LB: loop body
LE: loop exit
PB: predicated region body
PF: predicated region fallthrough
CT: control target
= control target key end

     0   :  { %8 = vsyncpa [#allocation3], 0  ;;  %s1049_s0 = inlined_call_operand.hbm [shape: bf16[2,24,128], index: 0, kind: input, shape index: {}]   ;;  %s1050_s1 = inlined_call_operand.hbm [shape: bf16[128,128], index: 1, kind: input, shape index: {}]   ;;  %s1051_s2 = inlined_call_operand.hbm [shape: f32[24,128], index: 2, kind: input, shape index: {}]   ;;  %s1052_s3 = inlined_call_operand.hbm [shape: f32[2,24,128], index: 3, kind: output, shape index: {}]  }
   0x1   :  { %10 = vsyncpa [#allocation3 + $0x1], 0 }
   0x2   :  { %11 = vsyncpa [#allocation6], 0 }
   0x3   :  { %12 = vsyncpa [#allocation4], 0 }
   0x4   :  { %14 = vsyncpa [#allocation4 + $0x1], 0  ;;  %s856_s12 = smov 0   ;;  %s858_s13 = smov 0  }
   0x5   :  { %s860_s14 = smov 0   ;;  %s862_s15 = smov 0  }
   0x6   :  { %s864_s16 = smov 0   ;;  %s866_s17 = smov 0  }
   0x7 LB: > { %s503_s18 = sadd.s32 4294967295, %s824_s17   ;;  %s504_s19 = sadd.s32 4294967294, %s824_s17   ;;  %s824_s17 = sphi %s866_s17, %s20_s17   ;;  %s820_s16 = sphi %s864_s16, %s1070_s16   ;;  %s816_s15 = sphi %s862_s15, %s1069_s15   ;;  %s812_s14 = sphi %s860_s14, %s1068_s14   ;;  %s808_s13 = sphi %s858_s13, %s1067_s13   ;;  %s804_s12 = sphi %s856_s12, %s1066_s12  }
   0x8   : > { %p54_p0 = scmp.ne.s32.totalorder %s808_s13, %s804_s12  ;;  %p890_p1 = scmp.eq.s32.totalorder %s503_s18, 0 }
   0x9   : > { %p894_p2 = scmp.eq.s32.totalorder %s503_s18, 1  ;;  %p133_p3 = scmp.eq.s32.totalorder %s504_s19, 1 }
   0xa   : > { %p900_p4 = por %p890_p1, %p54_p0  ;;  %p505_p5 = scmp.ge.s32.totalorder %s824_s17, 1 }
   0xb   : > { %p905_p6 = por %p133_p3, %p54_p0  ;;  %p140_p7 = scmp.lt.s32.totalorder %s824_s17, 3 }
   0xc   : > { %s826_s25 = smov [#allocation5]   ;;  %s827_s28 = smov [#allocation7]  }
   0xd   : > { %p910_p8 = pnand %p505_p5, %p140_p7  ;;  %s152_s26 = sshll.u32 %s826_s25, 4  ;;  %s153_s26 = int_to_ptr.vmem [resolvable:$true] %s152_s26 }
   0xe   : > { %s168_s29 = sshll.u32 %s827_s28, 4  ;;  %s671_s30 = scalar_lea.vmem %s153_s26, 1024  ;;  %s169_s29 = int_to_ptr.vmem [resolvable:$true] %s168_s29 }
   0xf   : > { %p573_p9 = pneg %p910_p8  ;;  %p672_p13 = scmp.ne.s32.totalorder %s153_s26, %s671_s30 }
  0x10   : > { %p679_p5 = scmp.lt.s32.totalorder %s153_s26, %s153_s26  ;;  %p680_p7 = scmp.lt.s32.totalorder %s671_s30, %s671_s30 }
  0x11   : > { %p919_p11 = pnand %p573_p9, %p890_p1 }
  0x12   : > { %p681_p10 = por %p680_p7, %p679_p5 }
  0x13   : > { %p662_p12 = pneg %p919_p11 }
  0x15   : > { %p674_p0 = pnand %p672_p13, %p662_p12 }
  0x17   : > { %p675_p3 = pneg %p674_p0 }
  0x19   : > { %p682_p9 = pnand %p681_p10, %p675_p3 }
  0x1b   : > { %685 = shalt.err (!%p682_p9)
}
  0x1c   : > { %s1053_s4 = smov 64   ;;  %s1054_s5 = smov 4  }
  0x1d   : > { %576 = dma.hbm_to_vmem [thread:$0]  (!%p919_p11), %s1050_s1, 1024, %s153_s26, [#allocation6], %s1053_s4, %s1053_s4, %s1054_s5  }
  0x1e   : > { %s697_s8 = scalar_lea.vmem %s169_s29, 384  ;;  %p705_p10 = scmp.lt.s32.totalorder %s169_s29, %s169_s29 }
  0x1f   : > { %p698_p13 = scmp.ne.s32.totalorder %s169_s29, %s697_s8  ;;  %p706_p3 = scmp.lt.s32.totalorder %s697_s8, %s697_s8 }
  0x21   : > { %p700_p0 = pnand %p698_p13, %p662_p12  ;;  %p707_p7 = por %p706_p3, %p705_p10 }
  0x23   : > { %p701_p5 = pneg %p700_p0 }
  0x25   : > { %p708_p9 = pnand %p707_p7, %p701_p5 }
  0x27   : > { %711 = shalt.err (!%p708_p9)
}
  0x28   : > { %s830_s9 = smov 128   ;;  %s831_s10 = smov 8  }
  0x29   : > { %579 = dma.hbm_to_vmem [thread:$0]  (!%p919_p11), %s1051_s2, 384, %s169_s29, [#allocation6], %s830_s9, %s830_s9, %s831_s10  }
  0x2a   : > { %s32_s19 = sadd.s32 1, %s820_s16  ;;  %s41_s25 = sadd.s32 1, %s812_s14 }
  0x2b   : > { %p34_p12 = scmp.ge.s32.totalorder %s32_s19, 2  ;;  %p48_p13 = scmp.ne.s32.totalorder %s812_s14, %s808_s13 }
  0x2c   : > { %p49_p0 = scmp.eq.s32.totalorder %s824_s17, 0  ;;  %p590_p5 = scmp.lt.s32.totalorder %s824_s17, 2 }
  0x2d   : > { %s1072_s19 = smov (%p34_p12, %s32_s19), 0  ;;  %p954_p3 = por %p894_p2, %p48_p13 }
  0x2e   : > { %p50_p10 = por %p49_p0, %p48_p13  ;;  %s36_s27 = ssub.s32 %s820_s16, %s1072_s19 }
  0x2f   : > { %s182_s28 = sand.u32 1, %s812_s14   ;;  %p39_p7 = scmp.eq.s32.totalorder %s36_s27, 0 }
  0x30   : > { %s556_s29 = smul.u32 12, %s182_s28  ;;  %p961_p11 = pnand %p590_p5, %p50_p10 }
  0x31   : > { %s966_s6 = scalar_select %p39_p7, %s812_s14, %s41_s25  }
  0x32   : > { %s557_s7 = smul.u32 192, %s820_s16  ;;  %s186_s8 = scalar_lea.vmem [#allocation2], %s556_s29 }
  0x33   : > { %s195_s9 = sshll.u32 %s186_s8, 4  ;;  %s183_s18 = scalar_lea.sflag [#allocation3], %s182_s28  ;;  %s196_s9 = int_to_ptr.vmem [resolvable:$true] %s195_s9 }
  0x34   : > { %s194_s11 = scalar_lea.hbm %s1049_s0, %s557_s7  ;;  %p714_p2 = pneg %p961_p11 }
  0x35   : > { %s725_s27 = scalar_lea.vmem %s196_s9, 192  ;;  %s832_s4 = smov [#allocation2]  }
  0x36   : > { %p726_p9 = scmp.ne.s32.totalorder %s196_s9, %s725_s27  ;;  %s730_s5 = sshll.u32 %s832_s4, 4  ;;  %s731_s5 = int_to_ptr.vmem [resolvable:$false] %s730_s5 }
  0x37   : > { %s732_s25 = scalar_lea.vmem %s731_s5, 384  ;;  %p733_p0 = scmp.lt.s32.totalorder %s196_s9, %s731_s5 }
  0x38   : > { %p728_p12 = pnand %p726_p9, %p714_p2  ;;  %p734_p5 = scmp.lt.s32.totalorder %s732_s25, %s725_s27 }
  0x3a   : > { %p729_p13 = pneg %p728_p12  ;;  %p735_p10 = por %p734_p5, %p733_p0 }
  0x3c   : > { %p736_p7 = pnand %p735_p10, %p729_p13 }
  0x3e   : > { %739 = shalt.err (!%p736_p7)
}
  0x3f   : > { %s1063_s29 = smov 4   ;;  %s1064_s7 = smov 64  }
  0x40   : > { %583 = dma.hbm_to_vmem [thread:$0]  (!%p961_p11), %s194_s11, 192, %s196_s9, %s183_s18, %s1064_s7, %s1064_s7, %s1063_s29  }
  0x41   : > { %207 = sbr.rel (%p910_p8) target bundleno = 321 (0x141), region = 32  ;;  %s982_s28 = sand.u32 (!%p910_p8), 1, %s808_s13  }
  0x42   : > { %s558_s4 = smul.u32 (!%p910_p8), 12, %s982_s28  ;;  %s210_s5 = scalar_lea.sflag (!%p910_p8), [#allocation3], %s982_s28 }
  0x44   : > { %s213_s8 = scalar_lea.vmem (!%p910_p8), [#allocation2], %s558_s4 }
  0x46   : > { %791 = dma.done.wait (%p900_p4), %s210_s5, 192  }
  0x47   : > { %793 = vsyncadd (%p900_p4), %s210_s5, 4294967104 }
  0x48   : > { %795 = dma.done.wait (%p890_p1), [#allocation6], 1408  }
  0x49   : > { %797 = vsyncadd (%p890_p1), [#allocation6], 4294965888  ;;  %v650_v0 = vld [vmem:[#allocation5 + $0x38] sm:$0xff]   ;;  %v651_v1 = vld [vmem:[#allocation5 + $0x30] sm:$0xff]   ;;  %s559_s20 = smul.u32 24, %s982_s28  ;;  %s380_s11 = scalar_lea.sflag [#allocation4], %s982_s28 }
  0x4a   : > { %536 = vmatprep.subr.bf16.mxu0 %v650_v0  ;;  %v652_v2 = vld [vmem:[#allocation5 + $0x28] sm:$0xff]   ;;  %v653_v3 = vld [vmem:[#allocation5 + $0x20] sm:$0xff]   ;;  %v654_v5 = vld [vmem:[#allocation5 + $0x18] sm:$0xff]   ;;  %s560_s30 = smul.u32 384, %s816_s15  ;;  %s833_s18 = smov [#allocation8]  }
  0x4b   : > { %537 = vmatpush3.bf16.msra.mxu0 %v650_v0  ;;  %v658_v4 = vld [vmem:[%s213_s8] sm:$0xff]   ;;  %v657_v8 = vld [vmem:[#allocation5] sm:$0xff]   ;;  %v659_v9 = vld [vmem:[%s213_s8 + $0x8] ss:$0 sps:$4 sm:$0xff]   ;;  %s243_s22 = scalar_lea.vmem [#allocation8], %s559_s20  ;;  %s744_s27 = sshll.u32 %s833_s18, 4  ;;  %s745_s27 = int_to_ptr.vmem [resolvable:$false] %s744_s27 }
  0x4c   : > { %538 = vmatprep.subr.bf16.mxu0 %v651_v1  ;;  %552 = vmatprep.mubr.bf16.mxu0 %v658_v4  ;;  %v655_v6 = vld [vmem:[#allocation5 + $0x10] sm:$0xff]   ;;  %v656_v7 = vld [vmem:[#allocation5 + $0x8] sm:$0xff]   ;;  %v267_v12 = vld [vmem:[#allocation7] sm:$0xff]  ;;  %s395_s24 = sshll.u32 %s243_s22, 4  ;;  %s1001_s21 = scalar_lea.hbm %s1052_s3, %s560_s30  ;;  %s996_s24 = int_to_ptr.vmem [resolvable:$true] %s395_s24 }
  0x4d   : > { %v269_v10 = vld [vmem:[#allocation7 + $0x10] sm:$0xff]  ;;  %v268_v17 = vld [vmem:[#allocation7 + $0x8] sm:$0xff]  ;;  %s740_s15 = scalar_lea.vmem %s996_s24, 384  ;;  %s746_s25 = scalar_lea.vmem %s745_s27, 768 }
  0x4e   : > { %p741_p1 = scmp.ne.s32.totalorder %s996_s24, %s740_s15  ;;  %p747_p11 = scmp.lt.s32.totalorder %s996_s24, %s745_s27 }
  0x4f   : > { %539 = vmatpush3.bf16.msra.mxu0 %v651_v1  ;;  %p748_p2 = scmp.lt.s32.totalorder %s746_s25, %s740_s15 }
  0x50   : > { %540 = vmatprep.subr.bf16.mxu0 %v652_v2  ;;  %p742_p4 = pnand %p741_p1, %p954_p3 }
  0x51   : > { %p749_p9 = por %p748_p2, %p747_p11 }
  0x52   : > { %p743_p8 = pneg %p742_p4 }
  0x53   : > { %541 = vmatpush3.bf16.msra.mxu0 %v652_v2 }
  0x54   : > { %542 = vmatprep.subr.bf16.mxu0 %v653_v3  ;;  %p750_p12 = pnand %p749_p9, %p743_p8 }
  0x57   : > { %543 = vmatpush3.bf16.msra.mxu0 %v653_v3 }
  0x58   : > { %544 = vmatprep.subr.bf16.mxu0 %v654_v5 }
  0x5b   : > { %545 = vmatpush3.bf16.msra.mxu0 %v654_v5 }
  0x5c   : > { %546 = vmatprep.subr.bf16.mxu0 %v655_v6 }
  0x5f   : > { %547 = vmatpush3.bf16.msra.mxu0 %v655_v6 }
  0x60   : > { %548 = vmatprep.subr.bf16.mxu0 %v656_v7 }
  0x63   : > { %549 = vmatpush3.bf16.msra.mxu0 %v656_v7 }
  0x64   : > { %550 = vmatprep.subr.bf16.mxu0 %v657_v8 }
  0x67   : > { %551 = vmatpush3.bf16.msra.mxu0 %v657_v8 }
  0x6a   : > { %553 = vmatmul.mubr.bf16.vlgmr.msra.gmra.mxu0 %v659_v9 }
 0x12a   : > { %v554_v11 = vpop.f32.mrf.mxu0 }
 0x12b   : > { %v371_v13 = vadd.f32 %v554_v11, %v269_v10 }
 0x12c   : > { %v362_v14 = vpop.f32.mrf.mxu0 }
 0x12d   : > { %378 = vst [vmem:[%s243_s22 + $0x10] sm:$0xff] %v371_v13  ;;  %v363_v15 = vadd.f32 %v362_v14, %v267_v12 }
 0x12e   : > { %v555_v16 = vpop.f32.mrf.mxu0 }
 0x12f   : > { %376 = vst [vmem:[%s243_s22] sm:$0xff] %v363_v15 }
 0x130   : > { %v365_v18 = vpop.f32.mrf.mxu0 }
 0x131   : > { %v366_v19 = vadd.f32 %v365_v18, %v268_v17 }
 0x133   : > { %377 = vst [vmem:[%s243_s22 + $0x8] sm:$0xff] %v366_v19 }
 0x134   : > { %753 = shalt.err (!%p750_p12)
}
 0x135   : > { %s754_s29 = scalar_lea.hbm %s1001_s21, 384  ;;  %s758_s5 = scalar_lea.hbm %s1052_s3, 768 }
 0x136   : > { %p755_p13 = scmp.ne.s32.totalorder %s1001_s21, %s754_s29  ;;  %p759_p10 = scmp.lt.s32.totalorder %s1001_s21, %s1052_s3 }
 0x137   : > { %p760_p7 = scmp.lt.s32.totalorder %s758_s5, %s754_s29 }
 0x138   : > { %p756_p0 = pnand %p755_p13, %p954_p3 }
 0x139   : > { %p761_p1 = por %p760_p7, %p759_p10 }
 0x13a   : > { %p757_p5 = pneg %p756_p0 }
 0x13c   : > { %p762_p4 = pnand %p761_p1, %p757_p5 }
 0x13e   : > { %765 = shalt.err (!%p762_p4)
}
 0x13f   : > { %s834_s22 = smov 128   ;;  %s835_s30 = smov 8  }
 0x140   : > { %571 = dma.vmem_to_hbm [thread:$0]  (%p954_p3), %s996_s24, 384, %s1001_s21, %s380_s11, %s834_s22, %s834_s22, %s835_s30  }
 0x141 PF: > { %s410_s9 = sand.u32 1, %s804_s12   ;;  %p1065_p8 = scmp.ge.s32.totalorder %s824_s17, 2 }
 0x142   : > { %s411_s10 = scalar_lea.sflag [#allocation4], %s410_s9 }
 0x143   : > { %p585_p11 = pnand %p1065_p8, %p905_p6 }
 0x145   : > { %p586_p2 = pneg %p585_p11 }
 0x147   : > { %799 = dma.done.wait (%p586_p2), %s411_s10, 384  }
 0x148   : > { %801 = vsyncadd (%p586_p2), %s411_s10, 4294966912  ;;  %s20_s17 = sadd.s32 1, %s824_s17   ;;  %s1066_s12 = smov %s808_s13 }
 0x149   : > { %p17_p9 = scmp.ge.s32.totalorder %s20_s17, 4   ;;  %s1067_s13 = smov %s812_s14 }
 0x14a   : > { %s1068_s14 = smov %s966_s6  ;;  %s1069_s15 = smov %s820_s16 }
 0x14b   : > { %s1070_s16 = smov %s1072_s19  ;;  %19 = sbr.rel (!%p17_p9) target bundleno = 7 (0x7), region = 86 }
 0x150   :  { %416 = vsyncpa [#allocation3], 1 }
 0x151   :  { %418 = vsyncpa [#allocation3 + $0x1], 1 }
 0x152   :  { %419 = vsyncpa [#allocation6], 1 }
 0x153   :  { %420 = vsyncpa [#allocation4], 1 }
 0x154   :  { %422 = vsyncpa [#allocation4 + $0x1], 1 }

</bundles_post_ra>
